<compile_context>
chip_gen: v7x
topology: tpu7x:2x2x1
jax: 0.10.0
libtpu: 0.0.40
codegen_flags: <defaults>
</compile_context>

<pallas_src>
import functools
import math

import numpy as np
import jax
import jax.numpy as jnp
from jax import lax
from jax.experimental import pallas as pl
from jax.experimental.pallas import tpu as pltpu

N_HEAD = 4                      # nhead of the TransformerDecoderLayer
NEG_INF = -1e9                  # stand-in for float('-inf') in the masks
VMEM_LIMIT = 48 * 1024 * 1024   # explicit scoped-VMEM cap (safe on v5e/v6e/v7x)


# ----------------------------------------------------------------------------
# Shared small math / host helpers
# ----------------------------------------------------------------------------
def _round_up(x, m):
    return ((x + m - 1) // m) * m


def _pick_tile(padded, max_tile=1024):
    """Largest multiple of 128 (<= max_tile) dividing the padded V3 extent."""
    best, t = 128, 128
    while t <= min(padded, max_tile):
        if padded % t == 0:
            best = t
        t += 128
    return best


def _pick_bb(batch, t, target_rows=256):
    """Batch elements per decoder grid step so that Bb*T ~ target MXU rows."""
    cap = max(1, min(batch, target_rows // max(t, 1)))
    for cand in range(cap, 0, -1):
        if batch % cand == 0:
            return cand
    return 1


def _layernorm(x, g, b, eps=1e-5):
    mu = jnp.mean(x, axis=-1, keepdims=True)
    xc = x - mu
    var = jnp.mean(xc * xc, axis=-1, keepdims=True)
    return xc * jax.lax.rsqrt(var + eps) * g + b


def _get_slopes(n):
    def pow2(n):
        start = 2 ** (-2 ** (-(math.log2(n) - 3)))
        return [start * start ** i for i in range(n)]
    if math.log2(n).is_integer():
        return pow2(n)
    c = 2 ** math.floor(math.log2(n))
    return pow2(c) + _get_slopes(2 * c)[0::2][: n - c]


def make_pe(d_model, period, T):
    """PeriodicPositionalEncoding buffer, sliced to length T."""
    pos = np.arange(period, dtype=np.float32)[:, None]
    div = np.exp(np.arange(0, d_model, 2, dtype=np.float32) *
                 (-math.log(10000.0) / d_model))
    pe = np.zeros((period, d_model), dtype=np.float32)
    pe[:, 0::2] = np.sin(pos * div)
    pe[:, 1::2] = np.cos(pos * div)
    pe = np.tile(pe, (T // period + 1, 1))
    return jnp.asarray(pe[:T])                            # (T, D)


# Host-side mask builders (pure-JAX reference only; the Pallas kernel builds
# the equivalent biases in-kernel from iota).
def make_tgt_bias(n_head, T, period):
    slopes = np.asarray(_get_slopes(n_head), dtype=np.float32)
    i = np.arange(T)[:, None]
    j = np.arange(T)[None, :]
    alibi = np.where(j <= i, -((i - j) // period).astype(np.float32), 0.0)
    causal = np.where(j <= i, 0.0, NEG_INF).astype(np.float32)
    bias = slopes[:, None, None] * alibi[None] + causal[None]
    return jnp.asarray(bias, dtype=jnp.float32)           # (H, T, T)


def make_mem_bias(T, S, dataset):
    m = np.full((T, S), NEG_INF, dtype=np.float32)
    if dataset == 'BIWI':
        for i in range(T):
            m[i, i * 2:i * 2 + 2] = 0.0
    elif dataset == 'vocaset':
        for i in range(T):
            if i < S:
                m[i, i] = 0.0
    return jnp.asarray(m)                                 # (T, S)


# ----------------------------------------------------------------------------
# Kernel 1: vertice_map + PPE.  V3 contraction tiled, (B*T) rows resident,
# weight streamed from HBM exactly once.
# ----------------------------------------------------------------------------
def embed_kernel(vin_ref, w_ref, b_ref, pe_ref, x0_ref, acc_ref):
    k = pl.program_id(0)

    @pl.when(k == 0)
    def _():
        acc_ref[...] = jnp.zeros_like(acc_ref)

    acc_ref[...] += jnp.dot(vin_ref[...], w_ref[...],
                            preferred_element_type=jnp.float32)

    @pl.when(k == pl.num_programs(0) - 1)
    def _():
        b, t, d = x0_ref.shape
        x0_ref[...] = ((acc_ref[...] + b_ref[...]).reshape(b, t, d)
                       + pe_ref[...][None])


# ----------------------------------------------------------------------------
# Kernel 2: one TransformerDecoderLayer, Bb batch elements per grid step
# ----------------------------------------------------------------------------
def _mha(q, k, v, wo, bo, bb, tq, tk, mask_fn):
    """Multi-head attention core.  q/k/v: (bb*t, D) projections (q already
    carries the 1/sqrt(dh) scale).  Per-head scores are batched over the Bb
    batch elements; head outputs are folded into the output projection as
    accumulating (dh, D) matmuls (no narrow-lane scratch stores)."""
    D = q.shape[-1]
    dh = D // N_HEAD
    out = None
    for h in range(N_HEAD):                     # static unroll, H = 4
        sl = slice(h * dh, (h + 1) * dh)
        qh = q[:, sl].reshape(bb, tq, dh)
        kh = k[:, sl].reshape(bb, tk, dh)
        vh = v[:, sl].reshape(bb, tk, dh)
        s = jnp.einsum('bqd,bkd->bqk', qh, kh,
                       preferred_element_type=jnp.float32)
        s = mask_fn(s, h)
        s = s - jnp.max(s, axis=-1, keepdims=True)
        p = jnp.exp(s)
        p = p * pl.reciprocal(jnp.sum(p, axis=-1, keepdims=True), approx=True)
        oh = jnp.einsum('bqk,bkd->bqd', p, vh,
                        preferred_element_type=jnp.float32)
        contrib = jnp.dot(oh.reshape(bb * tq, dh), wo[sl, :],
                          preferred_element_type=jnp.float32)
        out = contrib if out is None else out + contrib
    return out + bo


def decoder_kernel(x_ref, mem_ref,
                   sa_wqkv_ref, sa_bqkv_ref, sa_wo_ref, sa_bo_ref,
                   ln1_g_ref, ln1_b_ref,
                   ca_wq_ref, ca_bq_ref, ca_wkv_ref, ca_bkv_ref,
                   ca_wo_ref, ca_bo_ref,
                   ln2_g_ref, ln2_b_ref,
                   ff_w1_ref, ff_b1_ref, ff_w2_ref, ff_b2_ref,
                   ln3_g_ref, ln3_b_ref,
                   out_ref, *, period, dataset, slopes):
    x = x_ref[...]                               # (Bb, T, D)
    mem = mem_ref[...]                           # (Bb, S, D)
    Bb, T, D = x.shape
    S = mem.shape[1]

    # ---- attention masks generated in-kernel from iota (no (H,T,T)/(T,S)
    #      HBM traffic; only two (T,T) temporaries stay live — the per-head
    #      slope scaling and the causal mask are fused into one jnp.where).
    ti = lax.broadcasted_iota(jnp.int32, (T, T), 0)
    tj = lax.broadcasted_iota(jnp.int32, (T, T), 1)
    lower = tj <= ti
    dd = jnp.maximum(ti - tj, 0).astype(jnp.float32)
    # (i - j) // period.  The +0.5 offset keeps the f32 multiply/floor exact
    # for any realistic T (< ~1e5): (d + 0.5)/period is never within f32
    # rounding distance of an integer boundary.
    steps = jnp.floor((dd + 0.5) * (1.0 / float(period)))

    mi = lax.broadcasted_iota(jnp.int32, (T, S), 0)
    mj = lax.broadcasted_iota(jnp.int32, (T, S), 1)
    if dataset == 'BIWI':
        dm = mj - 2 * mi
        mem_ok = (dm == 0) | (dm == 1)
    else:  # 'vocaset' (rows with i >= S are fully masked -> uniform attn)
        mem_ok = (mj == mi)

    def tgt_mask(s, h):          # s: (Bb, T, T)
        return jnp.where(lower[None],
                         s - float(slopes[h]) * steps[None], NEG_INF)

    def mem_mask(s, h):          # s: (Bb, T, S)
        return jnp.where(mem_ok[None], s, NEG_INF)

    xf = x.reshape(Bb * T, D)
    memf = mem.reshape(Bb * S, D)

    # ---- self-attention (fused QKV; 1/sqrt(dh) folded into Wq host-side) --
    qkv = jnp.dot(xf, sa_wqkv_ref[...],
                  preferred_element_type=jnp.float32) + sa_bqkv_ref[...]
    sa = _mha(qkv[:, :D], qkv[:, D:2 * D], qkv[:, 2 * D:],
              sa_wo_ref[...], sa_bo_ref[...], Bb, T, T, tgt_mask)
    xf = _layernorm(xf + sa, ln1_g_ref[...], ln1_b_ref[...])

    # ---- cross-attention (fused KV on the audio memory) -------------------
    q = jnp.dot(xf, ca_wq_ref[...],
                preferred_element_type=jnp.float32) + ca_bq_ref[...]
    kv = jnp.dot(memf, ca_wkv_ref[...],
                 preferred_element_type=jnp.float32) + ca_bkv_ref[...]
    ca = _mha(q, kv[:, :D], kv[:, D:],
              ca_wo_ref[...], ca_bo_ref[...], Bb, T, S, mem_mask)
    xf = _layernorm(xf + ca, ln2_g_ref[...], ln2_b_ref[...])

    # ---- feed-forward (ReLU) ----------------------------------------------
    h1 = jnp.maximum(
        jnp.dot(xf, ff_w1_ref[...], preferred_element_type=jnp.float32)
        + ff_b1_ref[...], 0.0)
    ff = jnp.dot(h1, ff_w2_ref[...],
                 preferred_element_type=jnp.float32) + ff_b2_ref[...]
    xf = _layernorm(xf + ff, ln3_g_ref[...], ln3_b_ref[...])

    out_ref[...] = xf.reshape(Bb, T, D)


# ----------------------------------------------------------------------------
# Kernel 3: vertice_map_r + template.  Decoder output resident, w_r streamed
# once, lane-dense V3 output tiles.
# ----------------------------------------------------------------------------
def outproj_kernel(x_ref, w_ref, b_ref, tmpl_ref, out_ref):
    b, t, d = x_ref.shape
    nt = w_ref.shape[1]
    y = jnp.dot(x_ref[...].reshape(b * t, d), w_ref[...],
                preferred_element_type=jnp.float32)
    out_ref[...] = (y.reshape(b, t, nt) + b_ref[...][None]
                    + tmpl_ref[...][:, None, :])


# ----------------------------------------------------------------------------
# Parameters (deterministic, shapes from Faceformer.__init__)
# ----------------------------------------------------------------------------
def init_params(key, feature_dim, vertice_dim, n_subjects):
    D, V3 = feature_dim, vertice_dim
    keys = iter(jax.random.split(key, 32))

    def nrm(shape, s=0.05):
        return (s * jax.random.normal(next(keys), shape)).astype(jnp.float32)

    def row(n, s=0.05):
        return nrm((1, n), s)

    ones = lambda n: jnp.ones((1, n), jnp.float32)
    zeros = lambda n: jnp.zeros((1, n), jnp.float32)

    weights = (
        nrm((V3, D)), row(D),                         # vertice_map  (W.T, b)
        nrm((D, D)), row(D),                          # self-attn  Wq.T, bq
        nrm((D, D)), row(D),                          #            Wk.T, bk
        nrm((D, D)), row(D),                          #            Wv.T, bv
        nrm((D, D)), row(D),                          #            out_proj
        ones(D), zeros(D),                            # LayerNorm1
        nrm((D, D)), row(D),                          # cross-attn Wq.T, bq
        nrm((D, D)), row(D),                          #            Wk.T, bk
        nrm((D, D)), row(D),                          #            Wv.T, bv
        nrm((D, D)), row(D),                          #            out_proj
        ones(D), zeros(D),                            # LayerNorm2
        nrm((D, 2 * D)), row(2 * D),                  # FFN linear1
        nrm((2 * D, D)), row(D),                      # FFN linear2
        ones(D), zeros(D),                            # LayerNorm3
        # vertice_map_r is zero-init in the module; randomized here so the
        # V3-tiled output-projection kernel is exercised non-trivially.
        nrm((D, V3)), row(V3),
    )
    obj_w = nrm((D, n_subjects))                      # obj_vector (no bias)
    # NOTE: audio_feature_map (768 -> D) exists in __init__ but is unused in
    # forward (hidden_states = audio_tensor directly), so it is omitted.
    return {'weights': weights, 'obj_vector_w': obj_w}


def _resident_spec(arr):
    nd = arr.ndim
    return pl.BlockSpec(arr.shape, lambda *_: (0,) * nd)


# ----------------------------------------------------------------------------
# Wrapper (teacher_forcing=True path of Faceformer.forward)
# ----------------------------------------------------------------------------
def faceformer_forward(params, audio, template, vertice, one_hot,
                       dataset='vocaset', period=4, use_bf16=True):
    B, T, V3 = vertice.shape
    S, D = audio.shape[1], audio.shape[2]
    BT = B * T

    (w_vm, b_vm,
     sa_wq, sa_bq, sa_wk, sa_bk, sa_wv, sa_bv, sa_wo, sa_bo,
     ln1_g, ln1_b,
     ca_wq, ca_bq, ca_wk, ca_bk, ca_wv, ca_bv, ca_wo, ca_bo,
     ln2_g, ln2_b,
     ff_w1, ff_b1, ff_w2, ff_b2,
     ln3_g, ln3_b,
     w_r, b_r) = params['weights']

    tmpl = template[:, None, :]                                   # (B, 1, V3)
    # obj_embedding / style_emb are computed by the module but unused on the
    # teacher-forcing path; keep the computation for fidelity.
    _obj_embedding = one_hot @ params['obj_vector_w'].T           # (B, D)

    vin = jnp.concatenate([tmpl, vertice[:, :-1]], axis=1) - tmpl  # (B, T, V3)
    pe = make_pe(D, period, T)                                     # (T, D)

    # bf16 streaming of the V3-sized (HBM-bandwidth-dominated) operands only;
    # all MXU accumulation stays f32.
    stream_dtype = jnp.bfloat16 if use_bf16 else jnp.float32

    # ------------------------------------------------ kernel 1: vertice_map
    V3p = _round_up(V3, 128)
    kt = _pick_tile(V3p)
    vin_p = jnp.pad(vin, ((0, 0), (0, 0), (0, V3p - V3))) if V3p > V3 else vin
    vin_flat = vin_p.reshape(BT, V3p).astype(stream_dtype)
    w_vm_p = (jnp.pad(w_vm, ((0, V3p - V3), (0, 0))) if V3p > V3 else w_vm
              ).astype(stream_dtype)

    x0 = pl.pallas_call(
        embed_kernel,
        out_shape=jax.ShapeDtypeStruct((B, T, D), jnp.float32),
        grid=(V3p // kt,),
        in_specs=[pl.BlockSpec((BT, kt), lambda k: (0, k)),
                  pl.BlockSpec((kt, D), lambda k: (k, 0)),
                  pl.BlockSpec((1, D), lambda k: (0, 0)),
                  pl.BlockSpec((T, D), lambda k: (0, 0))],
        out_specs=pl.BlockSpec((B, T, D), lambda k: (0, 0, 0)),
        scratch_shapes=[pltpu.VMEM((BT, D), jnp.float32)],
        compiler_params=pltpu.CompilerParams(
            dimension_semantics=("arbitrary",),
            vmem_limit_bytes=VMEM_LIMIT),
    )(vin_flat, w_vm_p, b_vm, pe)

    # ------------------------------------------------ kernel 2: decoder layer
    # fold the 1/sqrt(dh) attention scale into the query projections (free),
    # fuse QKV (self-attn) and KV (cross-attn) into single matmuls.
    scale = 1.0 / math.sqrt(D // N_HEAD)
    sa_wqkv = jnp.concatenate([sa_wq * scale, sa_wk, sa_wv], axis=1)  # (D,3D)
    sa_bqkv = jnp.concatenate([sa_bq * scale, sa_bk, sa_bv], axis=1)  # (1,3D)
    ca_wq_s, ca_bq_s = ca_wq * scale, ca_bq * scale
    ca_wkv = jnp.concatenate([ca_wk, ca_wv], axis=1)                  # (D,2D)
    ca_bkv = jnp.concatenate([ca_bk, ca_bv], axis=1)                  # (1,2D)

    dec_w = (sa_wqkv, sa_bqkv, sa_wo, sa_bo, ln1_g, ln1_b,
             ca_wq_s, ca_bq_s, ca_wkv, ca_bkv, ca_wo, ca_bo, ln2_g, ln2_b,
             ff_w1, ff_b1, ff_w2, ff_b2, ln3_g, ln3_b)
    slopes = tuple(float(s) for s in _get_slopes(N_HEAD))

    Bb = _pick_bb(B, T)

    dec = pl.pallas_call(
        functools.partial(decoder_kernel, period=period, dataset=dataset,
                          slopes=slopes),
        out_shape=jax.ShapeDtypeStruct((B, T, D), jnp.float32),
        grid=(B // Bb,),
        in_specs=([pl.BlockSpec((Bb, T, D), lambda b: (b, 0, 0)),
                   pl.BlockSpec((Bb, S, D), lambda b: (b, 0, 0))]
                  + [_resident_spec(w) for w in dec_w]),
        out_specs=pl.BlockSpec((Bb, T, D), lambda b: (b, 0, 0)),
        compiler_params=pltpu.CompilerParams(
            dimension_semantics=("parallel",),
            vmem_limit_bytes=VMEM_LIMIT),
    )(x0, audio, *dec_w)

    # ------------------------------------------------ kernel 3: vertice_map_r
    V3o = _round_up(V3, 128)
    nt = _pick_tile(V3o)
    w_r_p = (jnp.pad(w_r, ((0, 0), (0, V3o - V3))) if V3o > V3 else w_r
             ).astype(stream_dtype)
    b_r_p = jnp.pad(b_r, ((0, 0), (0, V3o - V3))) if V3o > V3 else b_r
    tmpl_p = (jnp.pad(template, ((0, 0), (0, V3o - V3))) if V3o > V3
              else template)
    dec_in = dec.astype(stream_dtype)

    out_p = pl.pallas_call(
        outproj_kernel,
        out_shape=jax.ShapeDtypeStruct((B, T, V3o), jnp.float32),
        grid=(V3o // nt,),
        in_specs=[pl.BlockSpec((B, T, D), lambda n: (0, 0, 0)),
                  pl.BlockSpec((D, nt), lambda n: (0, n)),
                  pl.BlockSpec((1, nt), lambda n: (0, n)),
                  pl.BlockSpec((B, nt), lambda n: (0, n))],
        out_specs=pl.BlockSpec((B, T, nt), lambda n: (0, 0, n)),
        compiler_params=pltpu.CompilerParams(
            dimension_semantics=("parallel",),
            vmem_limit_bytes=VMEM_LIMIT),
    )(dec_in, w_r_p, b_r_p, tmpl_p)

    out = out_p[:, :, :V3] if V3o > V3 else out_p
    # `out` is vertice_out (module output); `dec` is the decoder hidden state
    # (an existing intermediate, returned for validation only).
    return out, dec


# ----------------------------------------------------------------------------
# Pure-JAX reference (mirrors PyTorch math: host masks, exact softmax)
# ----------------------------------------------------------------------------
def _ref_mha(xq, xkv, wq, bq, wk, bk, wv, bv, wo, bo, bias_per_head):
    D = xq.shape[-1]
    dh = D // N_HEAD
    q = xq @ wq + bq
    k = xkv @ wk + bk
    v = xkv @ wv + bv
    scale = 1.0 / math.sqrt(dh)
    heads = []
    for h in range(N_HEAD):
        sl = slice(h * dh, (h + 1) * dh)
        s = (q[:, sl] * scale) @ k[:, sl].T + bias_per_head[h]
        s = s - jnp.max(s, axis=-1, keepdims=True)
        p = jnp.exp(s)
        p = p / jnp.sum(p, axis=-1, keepdims=True)
        heads.append(p @ v[:, sl])
    return jnp.concatenate(heads, axis=-1) @ wo + bo


def _ref_decoder(vin, mem, tmpl, pe, tgt_bias, mem_bias, w):
    (w_vm, b_vm,
     sa_wq, sa_bq, sa_wk, sa_bk, sa_wv, sa_bv, sa_wo, sa_bo,
     ln1_g, ln1_b,
     ca_wq, ca_bq, ca_wk, ca_bk, ca_wv, ca_bv, ca_wo, ca_bo,
     ln2_g, ln2_b,
     ff_w1, ff_b1, ff_w2, ff_b2,
     ln3_g, ln3_b,
     w_r, b_r) = w
    x = vin @ w_vm + b_vm + pe
    sa = _ref_mha(x, x, sa_wq, sa_bq, sa_wk, sa_bk, sa_wv, sa_bv, sa_wo, sa_bo,
                  [tgt_bias[h] for h in range(N_HEAD)])
    x = _layernorm(x + sa, ln1_g, ln1_b)
    ca = _ref_mha(x, mem, ca_wq, ca_bq, ca_wk, ca_bk, ca_wv, ca_bv, ca_wo, ca_bo,
                  [mem_bias] * N_HEAD)
    x = _layernorm(x + ca, ln2_g, ln2_b)
    h1 = jnp.maximum(x @ ff_w1 + ff_b1, 0.0)
    ff = h1 @ ff_w2 + ff_b2
    x = _layernorm(x + ff, ln3_g, ln3_b)
    out = x @ w_r + b_r + tmpl
    return x, out


def reference_forward(params, audio, template, vertice, one_hot,
                      dataset='vocaset', period=4):
    B, T, V3 = vertice.shape
    S, D = audio.shape[1], audio.shape[2]
    tmpl = template[:, None, :]
    vin = jnp.concatenate([tmpl, vertice[:, :-1]], axis=1) - tmpl
    pe = make_pe(D, period, T)
    tgt_bias = make_tgt_bias(N_HEAD, T, period)
    mem_bias = make_mem_bias(T, S, dataset)
    w = tuple(params['weights'])
    outs, decs = [], []
    for b in range(B):
        dec, out = _ref_decoder(vin[b], audio[b], tmpl[b], pe,
                                tgt_bias, mem_bias, w)
        outs.append(out)
        decs.append(dec)
    return jnp.stack(outs), jnp.stack(decs)


# ----------------------------------------------------------------------------
if __name__ == "__main__":
    B, T, S = 2, 16, 16        # batch, vertice frames, audio frames
    D, V3 = 64, 1200           # feature_dim, vertice_dim (V*3; NOT 128-aligned
                               #  -> exercises the padded / tiled V3 path)
    NSUBJ, PERIOD = 3, 4       # len(train_subjects.split()), args.period
    DATASET = 'vocaset'

    key = jax.random.PRNGKey(0)
    kp, ka, ktmp, kv = jax.random.split(key, 4)
    params = init_params(kp, D, V3, NSUBJ)

    # audio_tensor already carries feature_dim channels (forward uses
    # hidden_states = audio_tensor directly as decoder memory).
    audio = jax.random.normal(ka, (B, S, D), jnp.float32)
    template = 0.1 * jax.random.normal(ktmp, (B, V3), jnp.float32)
    vertice = 0.1 * jax.random.normal(kv, (B, T, V3), jnp.float32)
    one_hot = jnp.zeros((B, NSUBJ), jnp.float32).at[:, 0].set(1.0)

    ref_out, ref_dec = reference_forward(params, audio, template, vertice,
                                         one_hot, dataset=DATASET,
                                         period=PERIOD)

    # --- f32 weight streaming: tight check against the pure-JAX reference ---
    out32, dec32 = faceformer_forward(params, audio, template, vertice,
                                      one_hot, dataset=DATASET, period=PERIOD,
                                      use_bf16=False)
    jax.block_until_ready((out32, dec32))
    np.testing.assert_allclose(np.asarray(dec32), np.asarray(ref_dec),
                               rtol=5e-3, atol=5e-3)
    np.testing.assert_allclose(np.asarray(out32), np.asarray(ref_out),
                               rtol=5e-3, atol=5e-3)

    # --- bf16 streaming of the V3-sized operands (kernels 1 & 3), f32 acc ---
    out16, dec16 = faceformer_forward(params, audio, template, vertice,
                                      one_hot, dataset=DATASET, period=PERIOD,
                                      use_bf16=True)
    jax.block_until_ready((out16, dec16))
    np.testing.assert_allclose(np.asarray(dec16), np.asarray(ref_dec),
                               rtol=3e-2, atol=3e-2)
    np.testing.assert_allclose(np.asarray(out16), np.asarray(ref_out),
                               rtol=3e-2, atol=3e-2)

    print("KERNEL_OK")
</pallas_src>

<mosaic_0001>
module attributes {stable_mosaic.version = 11 : i64} {
  func.func @embed_kernel(%arg0: i32, %arg1: memref<32x640xf32, #tpu.memory_space<vmem>>, %arg2: memref<640x64xf32, #tpu.memory_space<vmem>>, %arg3: memref<1x64xf32, #tpu.memory_space<vmem>>, %arg4: memref<16x64xf32, #tpu.memory_space<vmem>>, %arg5: memref<2x16x64xf32, #tpu.memory_space<vmem>>, %arg6: memref<32x64xf32, #tpu.memory_space<vmem>>) attributes {dimension_semantics = [#tpu.dimension_semantics<arbitrary>], iteration_bounds = array<i64: 2>, scalar_prefetch = 0 : i64, scratch_operands = 1 : i64, tpu.core_type = #tpu.core_type<tc>, window_params = [{transform_indices = @transform_0, window_bounds = array<i64: 32, 640>}, {transform_indices = @transform_1, window_bounds = array<i64: 640, 64>}, {pipeline_mode = #tpu.pipeline_mode<synchronous>, transform_indices = @transform_2, window_bounds = array<i64: 1, 64>}, {pipeline_mode = #tpu.pipeline_mode<synchronous>, transform_indices = @transform_3, window_bounds = array<i64: 16, 64>}, {pipeline_mode = #tpu.pipeline_mode<synchronous>, transform_indices = @transform_4, window_bounds = array<i64: 2, 16, 64>}]} {
    %c0_i32 = arith.constant 0 : i32
    %0 = arith.cmpi eq, %arg0, %c0_i32 : i32
    %1 = arith.extui %0 : i1 to i32
    %c0_i32_0 = arith.constant 0 : i32
    %2 = arith.cmpi ne, %1, %c0_i32_0 : i32
    scf.if %2 {
      %cst_9 = arith.constant 0.000000e+00 : f32
      %12 = vector.broadcast %cst_9 : f32 to vector<32x64xf32>
      %c0_10 = arith.constant 0 : index
      %c0_11 = arith.constant 0 : index
      %13 = vector.load %arg6[%c0_10, %c0_11] : memref<32x64xf32, #tpu.memory_space<vmem>>, vector<32x64xf32>
      tpu.vector_store %arg6[%c0_10, %c0_11], %12 {strides = array<i32>} : memref<32x64xf32, #tpu.memory_space<vmem>>, vector<32x64xf32>,
    } else {
    }
    %c0 = arith.constant 0 : index
    %c0_1 = arith.constant 0 : index
    %3 = vector.load %arg6[%c0, %c0_1] : memref<32x64xf32, #tpu.memory_space<vmem>>, vector<32x64xf32>
    %c0_2 = arith.constant 0 : index
    %c0_3 = arith.constant 0 : index
    %4 = vector.load %arg1[%c0_2, %c0_3] : memref<32x640xf32, #tpu.memory_space<vmem>>, vector<32x640xf32>
    %c0_4 = arith.constant 0 : index
    %c0_5 = arith.constant 0 : index
    %5 = vector.load %arg2[%c0_4, %c0_5] : memref<640x64xf32, #tpu.memory_space<vmem>>, vector<640x64xf32>
    %cst = arith.constant dense<0.000000e+00> : vector<32x64xf32>
    %6 = tpu.matmul %4, %5, %cst {dimension_numbers = #tpu.dot_dimension_numbers<[1], [0], [0], [1], [0, 0, 1, 1], [], []>} : vector<32x640xf32>, vector<640x64xf32>, vector<32x64xf32> -> vector<32x64xf32>
    %7 = arith.addf %3, %6 : vector<32x64xf32>
    %c0_6 = arith.constant 0 : index
    %c0_7 = arith.constant 0 : index
    %8 = vector.load %arg6[%c0_6, %c0_7] : memref<32x64xf32, #tpu.memory_space<vmem>>, vector<32x64xf32>
    tpu.vector_store %arg6[%c0_6, %c0_7], %7 {strides = array<i32>} : memref<32x64xf32, #tpu.memory_space<vmem>>, vector<32x64xf32>,
    %c1_i32 = arith.constant 1 : i32
    %9 = arith.cmpi eq, %arg0, %c1_i32 : i32
    %10 = arith.extui %9 : i1 to i32
    %c0_i32_8 = arith.constant 0 : i32
    %11 = arith.cmpi ne, %10, %c0_i32_8 : i32
    scf.if %11 {
      %c0_9 = arith.constant 0 : index
      %c0_10 = arith.constant 0 : index
      %12 = vector.load %arg6[%c0_9, %c0_10] : memref<32x64xf32, #tpu.memory_space<vmem>>, vector<32x64xf32>
      %c0_11 = arith.constant 0 : index
      %c0_12 = arith.constant 0 : index
      %13 = vector.load %arg3[%c0_11, %c0_12] : memref<1x64xf32, #tpu.memory_space<vmem>>, vector<1x64xf32>
      %14 = vector.broadcast %13 : vector<1x64xf32> to vector<32x64xf32>
      %15 = arith.addf %12, %14 : vector<32x64xf32>
      %16 = vector.shape_cast %15 : vector<32x64xf32> to vector<2x16x64xf32>
      %c0_13 = arith.constant 0 : index
      %c0_14 = arith.constant 0 : index
      %17 = vector.load %arg4[%c0_13, %c0_14] : memref<16x64xf32, #tpu.memory_space<vmem>>, vector<16x64xf32>
      %18 = vector.shape_cast %17 : vector<16x64xf32> to vector<1x16x64xf32>
      %19 = vector.broadcast %18 : vector<1x16x64xf32> to vector<2x16x64xf32>
      %20 = arith.addf %16, %19 : vector<2x16x64xf32>
      %c0_15 = arith.constant 0 : index
      %c0_16 = arith.constant 0 : index
      %c0_17 = arith.constant 0 : index
      %21 = vector.load %arg5[%c0_15, %c0_16, %c0_17] : memref<2x16x64xf32, #tpu.memory_space<vmem>>, vector<2x16x64xf32>
      tpu.vector_store %arg5[%c0_15, %c0_16, %c0_17], %20 {strides = array<i32>} : memref<2x16x64xf32, #tpu.memory_space<vmem>>, vector<2x16x64xf32>,
    } else {
    }
    return
  }
  func.func @transform_0(%arg0: i32) -> (i32, i32) {
    %c0_i32 = arith.constant 0 : i32
    %c0_i32_0 = arith.constant 0 : i32
    return %c0_i32, %arg0 : i32, i32
  }
  func.func @transform_1(%arg0: i32) -> (i32, i32) {
    %c0_i32 = arith.constant 0 : i32
    %c0_i32_0 = arith.constant 0 : i32
    return %arg0, %c0_i32 : i32, i32
  }
  func.func @transform_2(%arg0: i32) -> (i32, i32) {
    %c0_i32 = arith.constant 0 : i32
    %c0_i32_0 = arith.constant 0 : i32
    %c0_i32_1 = arith.constant 0 : i32
    return %c0_i32, %c0_i32_0 : i32, i32
  }
  func.func @transform_3(%arg0: i32) -> (i32, i32) {
    %c0_i32 = arith.constant 0 : i32
    %c0_i32_0 = arith.constant 0 : i32
    %c0_i32_1 = arith.constant 0 : i32
    return %c0_i32, %c0_i32_0 : i32, i32
  }
  func.func @transform_4(%arg0: i32) -> (i32, i32, i32) {
    %c0_i32 = arith.constant 0 : i32
    %c0_i32_0 = arith.constant 0 : i32
    %c0_i32_1 = arith.constant 0 : i32
    %c0_i32_2 = arith.constant 0 : i32
    return %c0_i32, %c0_i32_0, %c0_i32_1 : i32, i32, i32
  }
}

</mosaic_0001>

<bundles_post_ra>
// kernel: tpu_custom_call.1
= control target key start
LH: loop header
LB: loop body
LE: loop exit
PB: predicated region body
PF: predicated region fallthrough
CT: control target
= control target key end

     0   :  { %9 = vsyncpa [#allocation5], 0  ;;  %s1128_s15 = smov 0   ;;  %s1130_s16 = smov 0   ;;  %s1371_s0 = inlined_call_operand.vmem [shape: f32[32,1280], index: 0, kind: input, shape index: {}]   ;;  %s1372_s1 = inlined_call_operand.vmem [shape: f32[1280,64], index: 1, kind: input, shape index: {}]   ;;  %s1373_s2 = inlined_call_operand.vmem [shape: f32[1,64], index: 2, kind: input, shape index: {}]   ;;  %s1374_s3 = inlined_call_operand.vmem [shape: f32[16,64], index: 3, kind: input, shape index: {}]   ;;  %s1375_s4 = inlined_call_operand.hbm [shape: f32[2,16,64], index: 4, kind: output, shape index: {}]  }
   0x1   :  { %s1132_s17 = smov 0  }
   0x2 LB: > { %s1144_s18 = sadd.s32 4294967295, %s1097_s17   ;;  %s1147_s19 = sadd.s32 1, %s1097_s17   ;;  %s1097_s17 = sphi %s1132_s17, %s1378_s17   ;;  %s1093_s16 = sphi %s1130_s16, %s1377_s16   ;;  %s1089_s15 = sphi %s1128_s15, %s1376_s15  }
   0x3   : > { %s19_s20 = ssub.s32 %s1097_s17, %s1147_s19  ;;  %s22_s21 = sadd.s32 1, %s1093_s16 }
   0x4   : > { %p20_p0 = scmp.eq.s32.totalorder %s19_s20, 0  ;;  %p29_p1 = scmp.ne.s32.totalorder %s1093_s16, %s1089_s15 }
   0x5   : > { %p30_p2 = scmp.eq.s32.totalorder %s1097_s17, 0  ;;  %p739_p4 = scmp.ge.s32.totalorder %s1097_s17, 2 }
   0x6   : > { %s1156_s22 = scalar_select %p20_p0, %s1093_s16, %s22_s21  }
   0x7   : > { %p31_p3 = por %p30_p2, %p29_p1  ;;  %150 = sbr.rel (%p739_p4) target bundleno = 29 (0x1d), region = 24 }
   0xe   : > { %153 = sbr.rel (!%p31_p3) target bundleno = 29 (0x1d), region = 28  ;;  %s155_s23 = sand.u32 (%p31_p3), 1, %s1093_s16  }
   0xf   : > { %s750_s24 = smul.u32 (%p31_p3), 40, %s1097_s17 }
  0x10   : > { %s1009_s25 = smul.u32 (%p31_p3), 160, %s155_s23 }
  0x11   : > { %s1164_s28 = scalar_lea.vmem (%p31_p3), %s1371_s0, %s750_s24 }
  0x12   : > { %v173_v0 = vld [vmem:[%s1164_s28] sm:$0xff] (%p31_p3)  ;;  %v175_v1 = vld [vmem:[%s1164_s28 + $0x8] sm:$0xff] (%p31_p3)  ;;  %v177_v2 = vld [vmem:[%s1164_s28 + $0x10] sm:$0xff] (%p31_p3)  ;;  %s1169_s29 = scalar_lea.vmem (%p31_p3), [#allocation3], %s1009_s25 }
  0x13   : > { %174 = vst [vmem:[%s1169_s29] sm:$0xff] (%p31_p3), %v173_v0  ;;  %176 = vst [vmem:[%s1169_s29 + $0x8] sm:$0xff] (%p31_p3), %v175_v1  ;;  %v179_v3 = vld [vmem:[%s1164_s28 + $0x18] sm:$0xff] (%p31_p3)  ;;  %v181_v4 = vld [vmem:[%s1164_s28 + $0x20] sm:$0xff] (%p31_p3) }
  0x14   : > { %178 = vst [vmem:[%s1169_s29 + $0x10] sm:$0xff] (%p31_p3), %v177_v2  ;;  %v183_v5 = vld [vmem:[%s1164_s28 + $0x50] sm:$0xff] (%p31_p3)  ;;  %180 = vst [vmem:[%s1169_s29 + $0x18] sm:$0xff] (%p31_p3), %v179_v3  ;;  %v185_v6 = vld [vmem:[%s1164_s28 + $0x58] sm:$0xff] (%p31_p3) }
  0x15   : > { %182 = vst [vmem:[%s1169_s29 + $0x20] sm:$0xff] %v181_v4  ;;  %184 = vst [vmem:[%s1169_s29 + $0x28] sm:$0xff] %v183_v5  ;;  %v187_v7 = vld [vmem:[%s1164_s28 + $0x60] sm:$0xff]  ;;  %v189_v8 = vld [vmem:[%s1164_s28 + $0x68] sm:$0xff] }
  0x16   : > { %186 = vst [vmem:[%s1169_s29 + $0x30] sm:$0xff] %v185_v6  ;;  %188 = vst [vmem:[%s1169_s29 + $0x38] sm:$0xff] %v187_v7  ;;  %v191_v9 = vld [vmem:[%s1164_s28 + $0x70] sm:$0xff]  ;;  %v193_v10 = vld [vmem:[%s1164_s28 + $0xa0] sm:$0xff] }
  0x17   : > { %190 = vst [vmem:[%s1169_s29 + $0x40] sm:$0xff] %v189_v8  ;;  %v195_v11 = vld [vmem:[%s1164_s28 + $0xa8] sm:$0xff]  ;;  %192 = vst [vmem:[%s1169_s29 + $0x48] sm:$0xff] %v191_v9  ;;  %v197_v12 = vld [vmem:[%s1164_s28 + $0xb0] sm:$0xff] }
  0x18   : > { %194 = vst [vmem:[%s1169_s29 + $0x50] sm:$0xff] %v193_v10  ;;  %196 = vst [vmem:[%s1169_s29 + $0x58] sm:$0xff] %v195_v11  ;;  %v199_v13 = vld [vmem:[%s1164_s28 + $0xb8] sm:$0xff]  ;;  %v201_v14 = vld [vmem:[%s1164_s28 + $0xc0] sm:$0xff] }
  0x19   : > { %198 = vst [vmem:[%s1169_s29 + $0x60] sm:$0xff] %v197_v12  ;;  %200 = vst [vmem:[%s1169_s29 + $0x68] sm:$0xff] %v199_v13  ;;  %v203_v15 = vld [vmem:[%s1164_s28 + $0xf0] sm:$0xff]  ;;  %v205_v16 = vld [vmem:[%s1164_s28 + $0xf8] sm:$0xff] }
  0x1a   : > { %202 = vst [vmem:[%s1169_s29 + $0x70] sm:$0xff] %v201_v14  ;;  %v207_v17 = vld [vmem:[%s1164_s28 + $0x100] sm:$0xff]  ;;  %204 = vst [vmem:[%s1169_s29 + $0x78] sm:$0xff] %v203_v15  ;;  %v209_v18 = vld [vmem:[%s1164_s28 + $0x108] sm:$0xff] }
  0x1b   : > { %206 = vst [vmem:[%s1169_s29 + $0x80] sm:$0xff] %v205_v16  ;;  %208 = vst [vmem:[%s1169_s29 + $0x88] sm:$0xff] %v207_v17  ;;  %v211_v19 = vld [vmem:[%s1164_s28 + $0x110] sm:$0xff] }
  0x1c   : > { %210 = vst [vmem:[%s1169_s29 + $0x90] sm:$0xff] %v209_v18  ;;  %212 = vst [vmem:[%s1169_s29 + $0x98] sm:$0xff] %v211_v19 }
  0x1d PF: > { %p741_p5 = scmp.ge.s32.totalorder %s1097_s17, 1  ;;  %p226_p6 = scmp.lt.s32.totalorder %s1097_s17, 3 }
  0x1f   : > { %p227_p7 = pnand %p741_p5, %p226_p6 }
  0x20   : > { %s233_s30 = sand.u32 (!%p227_p7), 1, %s1089_s15   ;;  %s259_s5 = smul.u32 (!%p227_p7), 80, %s1144_s18 }
  0x21   : > { %230 = sbr.rel (%p227_p7) target bundleno = 372 (0x174), region = 55  ;;  %p743_p9 = scmp.ne.s32.totalorder (!%p227_p7), %s1144_s18, 0 }
  0x22   : > { %s1010_s6 = smul.u32 (!%p227_p7), 160, %s233_s30  ;;  %p260_p8 = scmp.lt.s32.totalorder (!%p227_p7), %s259_s5, 159 }
  0x24   : > { %s1217_s11 = scalar_lea.vmem (!%p227_p7), [#allocation3], %s1010_s6 }
  0x28   : > { %s1380_s5 = smov (!%p260_p8, %s259_s5), 159  ;;  %268 = sbr.rel (%p743_p9) target bundleno = 47 (0x2f), region = 63 }
  0x29   : > { %s742_s7 = sshll.u32 %s1380_s5, 3  ;;  %vm269_vm0 = vcmask (!%p743_p9), 523264   ;;  %v1099_v20 = vmov (!%p743_p9), 0.0  }
  0x2a   : > { %s1215_s10 = scalar_lea.vmem %s1372_s1, %s742_s7  ;;  %270 = vst.msk [vmem:[#allocation2] sm:$0xff] (!%p743_p9), %vm269_vm0, %v1099_v20  ;;  %271 = vst.msk [vmem:[#allocation2 + $0x8] sm:$0xff] (!%p743_p9), %vm269_vm0, %v1099_v20 }
  0x2b   : > { %272 = vst.msk [vmem:[#allocation2 + $0x10] sm:$0xff] (!%p743_p9), %vm269_vm0, %v1099_v20  ;;  %273 = vst.msk [vmem:[#allocation2 + $0x18] sm:$0xff] (!%p743_p9), %vm269_vm0, %v1099_v20 }
  0x2f PF: > { %v314_v21 = vld [vmem:[%s1215_s10 + $0x80] sm:$0xff]  ;;  %v315_v22 = vld [vmem:[%s1215_s10 + $0x88] sm:$0xff]  ;;  %v316_v32 = vld [vmem:[%s1215_s10 + $0x90] sm:$0xff]  ;;  %vm637_vm1 = vcmask 523264   ;;  %p744_p10 = scmp.ne.s32.totalorder %s1144_s18, 1 }
  0x30   : > { %v346_v23 = vld [vmem:[%s1215_s10 + $0x180] sm:$0xff]  ;;  %v897_v24 = vpack.c.bf16 %v315_v22, %v314_v21  ;;  %v347_v25 = vld [vmem:[%s1215_s10 + $0x188] sm:$0xff]  ;;  %v317_v34 = vld [vmem:[%s1215_s10 + $0x98] sm:$0xff] }
  0x31   : > { %v298_v26 = vld [vmem:[%s1215_s10] sm:$0xff]  ;;  %v299_v27 = vld [vmem:[%s1215_s10 + $0x8] sm:$0xff]  ;;  %v929_v28 = vpack.c.bf16 %v347_v25, %v346_v23  ;;  %v348_v35 = vld [vmem:[%s1215_s10 + $0x190] sm:$0xff]  ;;  %v901_v37 = vpack.c.bf16 %v317_v34, %v316_v32 }
  0x32   : > { %v899_v29 = vpack.c.bf16 %v299_v27, %v298_v26  ;;  %v330_v30 = vld [vmem:[%s1215_s10 + $0x100] sm:$0xff]  ;;  %v331_v31 = vld [vmem:[%s1215_s10 + $0x108] sm:$0xff]  ;;  %898 = vmatprep.subr.bf16.mxu0 %v897_v24  ;;  %v349_v36 = vld [vmem:[%s1215_s10 + $0x198] sm:$0xff] }
  0x33   : > { %v931_v33 = vpack.c.bf16 %v331_v31, %v330_v30  ;;  %930 = vmatprep.subr.bf16.mxu1 %v929_v28  ;;  %v933_v38 = vpack.c.bf16 %v349_v36, %v348_v35  ;;  %v300_v39 = vld [vmem:[%s1215_s10 + $0x10] sm:$0xff]  ;;  %v301_v40 = vld [vmem:[%s1215_s10 + $0x18] sm:$0xff]  ;;  %v318_v44 = vld [vmem:[%s1215_s10 + $0xa0] sm:$0xff] }
  0x34   : > { %900 = vmatpush3.bf16.msra.mxu0 %v899_v29  ;;  %v332_v41 = vld [vmem:[%s1215_s10 + $0x110] sm:$0xff]  ;;  %v903_v42 = vpack.c.bf16 %v301_v40, %v300_v39  ;;  %v333_v43 = vld [vmem:[%s1215_s10 + $0x118] sm:$0xff]  ;;  %v319_v45 = vld [vmem:[%s1215_s10 + $0xa8] sm:$0xff] }
  0x35   : > { %932 = vmatpush3.bf16.msra.mxu1 %v931_v33  ;;  %902 = vmatprep.subr.bf16.mxu0 %v901_v37  ;;  %v935_v46 = vpack.c.bf16 %v333_v43, %v332_v41  ;;  %v905_v47 = vpack.c.bf16 %v319_v45, %v318_v44  ;;  %v350_v48 = vld [vmem:[%s1215_s10 + $0x1a0] sm:$0xff]  ;;  %v351_v49 = vld [vmem:[%s1215_s10 + $0x1a8] sm:$0xff]  ;;  %v320_v56 = vld [vmem:[%s1215_s10 + $0xb0] sm:$0xff] }
  0x36   : > { %934 = vmatprep.subr.bf16.mxu1 %v933_v38  ;;  %v302_v50 = vld [vmem:[%s1215_s10 + $0x20] sm:$0xff]  ;;  %v937_v51 = vpack.c.bf16 %v351_v49, %v350_v48  ;;  %v303_v52 = vld [vmem:[%s1215_s10 + $0x28] sm:$0xff]  ;;  %v321_v57 = vld [vmem:[%s1215_s10 + $0xb8] sm:$0xff] }
  0x37   : > { %v334_v53 = vld [vmem:[%s1215_s10 + $0x120] sm:$0xff]  ;;  %v335_v54 = vld [vmem:[%s1215_s10 + $0x128] sm:$0xff]  ;;  %v907_v55 = vpack.c.bf16 %v303_v52, %v302_v50  ;;  %v352_v58 = vld [vmem:[%s1215_s10 + $0x1b0] sm:$0xff]  ;;  %v909_v60 = vpack.c.bf16 %v321_v57, %v320_v56 }
  0x38   : > { %904 = vmatpush3.bf16.msra.mxu0 %v903_v42  ;;  %v939_v59 = vpack.c.bf16 %v335_v54, %v334_v53  ;;  %v353_v61 = vld [vmem:[%s1215_s10 + $0x1b8] sm:$0xff]  ;;  %v304_v62 = vld [vmem:[%s1215_s10 + $0x30] sm:$0xff]  ;;  %v322_v3 = vld [vmem:[%s1215_s10 + $0xc0] sm:$0xff] }
  0x39   : > { %936 = vmatpush3.bf16.msra.mxu1 %v935_v46  ;;  %906 = vmatprep.subr.bf16.mxu0 %v905_v47  ;;  %v305_v63 = vld [vmem:[%s1215_s10 + $0x38] sm:$0xff]  ;;  %v941_v0 = vpack.c.bf16 %v353_v61, %v352_v58  ;;  %v336_v1 = vld [vmem:[%s1215_s10 + $0x130] sm:$0xff]  ;;  %v323_v4 = vld [vmem:[%s1215_s10 + $0xc8] sm:$0xff] }
  0x3a   : > { %938 = vmatprep.subr.bf16.mxu1 %v937_v51  ;;  %v337_v2 = vld [vmem:[%s1215_s10 + $0x138] sm:$0xff]  ;;  %v354_v5 = vld [vmem:[%s1215_s10 + $0x1c0] sm:$0xff]  ;;  %v355_v6 = vld [vmem:[%s1215_s10 + $0x1c8] sm:$0xff]  ;;  %v911_v7 = vpack.c.bf16 %v305_v63, %v304_v62  ;;  %v913_v9 = vpack.c.bf16 %v323_v4, %v322_v3 }
  0x3b   : > { %v943_v8 = vpack.c.bf16 %v337_v2, %v336_v1  ;;  %v306_v10 = vld [vmem:[%s1215_s10 + $0x40] sm:$0xff]  ;;  %v307_v11 = vld [vmem:[%s1215_s10 + $0x48] sm:$0xff]  ;;  %v945_v13 = vpack.c.bf16 %v355_v6, %v354_v5  ;;  %v324_v15 = vld [vmem:[%s1215_s10 + $0xd0] sm:$0xff] }
  0x3c   : > { %908 = vmatpush3.bf16.msra.mxu0 %v907_v55  ;;  %v338_v12 = vld [vmem:[%s1215_s10 + $0x140] sm:$0xff]  ;;  %v339_v14 = vld [vmem:[%s1215_s10 + $0x148] sm:$0xff]  ;;  %v325_v16 = vld [vmem:[%s1215_s10 + $0xd8] sm:$0xff]  ;;  %v915_v19 = vpack.c.bf16 %v307_v11, %v306_v10 }
  0x3d   : > { %940 = vmatpush3.bf16.msra.mxu1 %v939_v59  ;;  %910 = vmatprep.subr.bf16.mxu0 %v909_v60  ;;  %v356_v17 = vld [vmem:[%s1215_s10 + $0x1d0] sm:$0xff]  ;;  %v357_v18 = vld [vmem:[%s1215_s10 + $0x1d8] sm:$0xff]  ;;  %v947_v20 = vpack.c.bf16 %v339_v14, %v338_v12  ;;  %v917_v21 = vpack.c.bf16 %v325_v16, %v324_v15  ;;  %v326_v27 = vld [vmem:[%s1215_s10 + $0xe0] sm:$0xff] }
  0x3e   : > { %942 = vmatprep.subr.bf16.mxu1 %v941_v0  ;;  %v308_v22 = vld [vmem:[%s1215_s10 + $0x50] sm:$0xff]  ;;  %v309_v23 = vld [vmem:[%s1215_s10 + $0x58] sm:$0xff]  ;;  %v949_v25 = vpack.c.bf16 %v357_v18, %v356_v17  ;;  %v327_v28 = vld [vmem:[%s1215_s10 + $0xe8] sm:$0xff] }
  0x3f   : > { %v340_v24 = vld [vmem:[%s1215_s10 + $0x150] sm:$0xff]  ;;  %v341_v26 = vld [vmem:[%s1215_s10 + $0x158] sm:$0xff]  ;;  %v358_v29 = vld [vmem:[%s1215_s10 + $0x1e0] sm:$0xff]  ;;  %v919_v31 = vpack.c.bf16 %v309_v23, %v308_v22  ;;  %v921_v35 = vpack.c.bf16 %v327_v28, %v326_v27 }
  0x40   : > { %912 = vmatpush3.bf16.msra.mxu0 %v911_v7  ;;  %v359_v30 = vld [vmem:[%s1215_s10 + $0x1e8] sm:$0xff]  ;;  %v310_v32 = vld [vmem:[%s1215_s10 + $0x60] sm:$0xff]  ;;  %v951_v34 = vpack.c.bf16 %v341_v26, %v340_v24  ;;  %v281_v38 = vld [vmem:[%s1217_s11 + $0x18] sm:$0xff] }
  0x41   : > { %944 = vmatpush3.bf16.msra.mxu1 %v943_v8  ;;  %914 = vmatprep.subr.bf16.mxu0 %v913_v9  ;;  %v311_v33 = vld [vmem:[%s1215_s10 + $0x68] sm:$0xff]  ;;  %v342_v36 = vld [vmem:[%s1215_s10 + $0x160] sm:$0xff]  ;;  %v953_v39 = vpack.c.bf16 %v359_v30, %v358_v29  ;;  %v328_v41 = vld [vmem:[%s1215_s10 + $0xf0] sm:$0xff] }
  0x42   : > { %946 = vmatprep.subr.bf16.mxu1 %v945_v13  ;;  %v279_v37 = vld [vmem:[%s1217_s11 + $0x8] sm:$0xff]  ;;  %v329_v42 = vld [vmem:[%s1215_s10 + $0xf8] sm:$0xff]  ;;  %v360_v43 = vld [vmem:[%s1215_s10 + $0x1f0] sm:$0xff]  ;;  %527 = vmatprep.mubr.f32.mxu1 %v281_v38  ;;  %v923_v45 = vpack.c.bf16 %v311_v33, %v310_v32 }
  0x43   : > { %v343_v40 = vld [vmem:[%s1215_s10 + $0x168] sm:$0xff]  ;;  %442 = vmatprep.mubr.f32.mxu0 %v279_v37  ;;  %v361_v44 = vld [vmem:[%s1215_s10 + $0x1f8] sm:$0xff]  ;;  %v925_v47 = vpack.c.bf16 %v329_v42, %v328_v41  ;;  %v312_v48 = vld [vmem:[%s1215_s10 + $0x70] sm:$0xff] }
  0x44   : > { %916 = vmatpush3.bf16.msra.mxu0 %v915_v19  ;;  %v955_v46 = vpack.c.bf16 %v343_v40, %v342_v36  ;;  %v313_v49 = vld [vmem:[%s1215_s10 + $0x78] sm:$0xff]  ;;  %v344_v50 = vld [vmem:[%s1215_s10 + $0x170] sm:$0xff]  ;;  %v957_v51 = vpack.c.bf16 %v361_v44, %v360_v43  ;;  %v362_v53 = vld [vmem:[%s1215_s10 + $0x200] sm:$0xff] }
  0x45   : > { %948 = vmatpush3.bf16.msra.mxu1 %v947_v20  ;;  %918 = vmatprep.subr.bf16.mxu0 %v917_v21  ;;  %v345_v52 = vld [vmem:[%s1215_s10 + $0x178] sm:$0xff]  ;;  %v363_v54 = vld [vmem:[%s1215_s10 + $0x208] sm:$0xff]  ;;  %v927_v55 = vpack.c.bf16 %v313_v49, %v312_v48  ;;  %v364_v58 = vld [vmem:[%s1215_s10 + $0x210] sm:$0xff] }
  0x46   : > { %950 = vmatprep.subr.bf16.mxu1 %v949_v25  ;;  %v959_v56 = vpack.c.bf16 %v345_v52, %v344_v50  ;;  %v961_v57 = vpack.c.bf16 %v363_v54, %v362_v53  ;;  %v365_v59 = vld [vmem:[%s1215_s10 + $0x218] sm:$0xff]  ;;  %v278_v60 = vld [vmem:[%s1217_s11] sm:$0xff]  ;;  %v280_v61 = vld [vmem:[%s1217_s11 + $0x10] sm:$0xff] }
  0x47   : > { %v965_v62 = vpack.c.bf16 %v365_v59, %v364_v58  ;;  %v366_v63 = vld [vmem:[%s1215_s10 + $0x220] sm:$0xff]  ;;  %v367_v0 = vld [vmem:[%s1215_s10 + $0x228] sm:$0xff]  ;;  %v284_v1 = vld [vmem:[%s1217_s11 + $0x30] sm:$0xff] }
  0x48   : > { %920 = vmatpush3.bf16.msra.mxu0 %v919_v31  ;;  %v286_v2 = vld [vmem:[%s1217_s11 + $0x40] sm:$0xff]  ;;  %v283_v3 = vld [vmem:[%s1217_s11 + $0x28] sm:$0xff]  ;;  %v969_v4 = vpack.c.bf16 %v367_v0, %v366_v63  ;;  %v285_v5 = vld [vmem:[%s1217_s11 + $0x38] sm:$0xff] }
  0x49   : > { %952 = vmatpush3.bf16.msra.mxu1 %v951_v34  ;;  %922 = vmatprep.subr.bf16.mxu0 %v921_v35  ;;  %v368_v6 = vld [vmem:[%s1215_s10 + $0x230] sm:$0xff]  ;;  %v369_v7 = vld [vmem:[%s1215_s10 + $0x238] sm:$0xff]  ;;  %v291_v9 = vld [vmem:[%s1217_s11 + $0x68] sm:$0xff] }
  0x4a   : > { %954 = vmatprep.subr.bf16.mxu1 %v953_v39  ;;  %v289_v8 = vld [vmem:[%s1217_s11 + $0x58] sm:$0xff]  ;;  %v288_v10 = vld [vmem:[%s1217_s11 + $0x50] sm:$0xff]  ;;  %v973_v11 = vpack.c.bf16 %v369_v7, %v368_v6  ;;  %v290_v12 = vld [vmem:[%s1217_s11 + $0x60] sm:$0xff] }
  0x4b   : > { %v370_v13 = vld [vmem:[%s1215_s10 + $0x240] sm:$0xff]  ;;  %v371_v14 = vld [vmem:[%s1215_s10 + $0x248] sm:$0xff]  ;;  %v296_v16 = vld [vmem:[%s1217_s11 + $0x90] sm:$0xff] }
  0x4c   : > { %924 = vmatpush3.bf16.msra.mxu0 %v923_v45  ;;  %v294_v15 = vld [vmem:[%s1217_s11 + $0x80] sm:$0xff]  ;;  %v293_v17 = vld [vmem:[%s1217_s11 + $0x78] sm:$0xff]  ;;  %v977_v18 = vpack.c.bf16 %v371_v14, %v370_v13  ;;  %v295_v19 = vld [vmem:[%s1217_s11 + $0x88] sm:$0xff] }
  0x4d   : > { %956 = vmatpush3.bf16.msra.mxu1 %v955_v46  ;;  %926 = vmatprep.subr.bf16.mxu0 %v925_v47  ;;  %v372_v20 = vld [vmem:[%s1215_s10 + $0x250] sm:$0xff]  ;;  %v373_v21 = vld [vmem:[%s1215_s10 + $0x258] sm:$0xff]  ;;  %v282_v22 = vld [vmem:[%s1217_s11 + $0x20] sm:$0xff] }
  0x4e   : > { %958 = vmatprep.subr.bf16.mxu1 %v957_v51  ;;  %v292_v23 = vld [vmem:[%s1217_s11 + $0x70] sm:$0xff]  ;;  %v981_v24 = vpack.c.bf16 %v373_v21, %v372_v20  ;;  %v374_v25 = vld [vmem:[%s1215_s10 + $0x260] sm:$0xff]  ;;  %v375_v26 = vld [vmem:[%s1215_s10 + $0x268] sm:$0xff] }
  0x4f   : > { %v985_v27 = vpack.c.bf16 %v375_v26, %v374_v25  ;;  %v376_v28 = vld [vmem:[%s1215_s10 + $0x270] sm:$0xff]  ;;  %v377_v29 = vld [vmem:[%s1215_s10 + $0x278] sm:$0xff]  ;;  %v287_v31 = vld [vmem:[%s1217_s11 + $0x48] sm:$0xff] }
  0x50   : > { %928 = vmatpush3.bf16.msra.mxu0 %v927_v55  ;;  %v989_v30 = vpack.c.bf16 %v377_v29, %v376_v28  ;;  %v297_v32 = vld [vmem:[%s1217_s11 + $0x98] sm:$0xff]  ;;  %v276_v6 = vld [vmem:[#allocation2 + $0x10] sm:$0xff]  ;;  %v745_v14 = vld [vmem:[%s1373_s2] ss:$0 sm:$0xff] (!%p744_p10) }
  0x51   : > { %960 = vmatpush3.bf16.msra.mxu1 %v959_v56  ;;  %962 = vmatprep.subr.bf16.mxu0 %v961_v57  ;;  %v277_v0 = vld [vmem:[#allocation2 + $0x18] sm:$0xff] }
  0x52   : > { %993 = vmatprep.subr.bf16.mxu1 %v961_v57 }
  0x53   : > { %443 = vmatmul.mubr.f32.vlgmr.msra.gmra.mrb[0].mxu0 %v278_v60 }
  0x54   : > { %528 = vmatmul.mubr.f32.vlgmr.msra.gmra.mrb[0].mxu1 %v280_v61  ;;  %964 = vmatpush3.bf16.msra.mxu0 %v961_v57  ;;  %v275_v61 = vld [vmem:[#allocation2 + $0x8] sm:$0xff] }
  0x55   : > { %1001 = vmatpush3.bf16.msra.mxu1 %v961_v57  ;;  %966 = vmatprep.subr.bf16.mxu0 %v965_v62 }
  0x56   : > { %994 = vmatprep.subr.bf16.mxu1 %v965_v62  ;;  %447 = vmatprep.mubr.f32.mxu0 %v284_v1 }
  0x57   : > { %532 = vmatprep.mubr.f32.mxu1 %v286_v2  ;;  %448 = vmatmul.mubr.f32.gmra.mrb[2].mxu0 %v283_v3  ;;  %v274_v2 = vld [vmem:[#allocation2] sm:$0xff] }
  0x58   : > { %968 = vmatpush3.bf16.msra.mxu0 %v965_v62  ;;  %533 = vmatmul.mubr.f32.gmra.mrb[2].mxu1 %v285_v5 }
  0x59   : > { %1002 = vmatpush3.bf16.msra.mxu1 %v965_v62  ;;  %970 = vmatprep.subr.bf16.mxu0 %v969_v4 }
  0x5a   : > { %995 = vmatprep.subr.bf16.mxu1 %v969_v4  ;;  %452 = vmatprep.mubr.f32.mxu0 %v289_v8 }
  0x5b   : > { %537 = vmatprep.mubr.f32.mxu1 %v291_v9  ;;  %453 = vmatmul.mubr.f32.gmra.mrb[4].mxu0 %v288_v10 }
  0x5c   : > { %972 = vmatpush3.bf16.msra.mxu0 %v969_v4  ;;  %538 = vmatmul.mubr.f32.gmra.mrb[4].mxu1 %v290_v12 }
  0x5d   : > { %1003 = vmatpush3.bf16.msra.mxu1 %v969_v4  ;;  %974 = vmatprep.subr.bf16.mxu0 %v973_v11 }
  0x5e   : > { %996 = vmatprep.subr.bf16.mxu1 %v973_v11  ;;  %457 = vmatprep.mubr.f32.mxu0 %v294_v15  ;;  %v661_v15 = vld [vmem:[%s1374_s3] sm:$0xff] (!%p744_p10) }
  0x5f   : > { %542 = vmatprep.mubr.f32.mxu1 %v296_v16  ;;  %458 = vmatmul.mubr.f32.gmra.mrb[6].mxu0 %v293_v17 }
  0x60   : > { %976 = vmatpush3.bf16.msra.mxu0 %v973_v11  ;;  %543 = vmatmul.mubr.f32.gmra.mrb[6].mxu1 %v295_v19 }
  0x61   : > { %1004 = vmatpush3.bf16.msra.mxu1 %v973_v11  ;;  %978 = vmatprep.subr.bf16.mxu0 %v977_v18 }
  0x62   : > { %997 = vmatprep.subr.bf16.mxu1 %v977_v18  ;;  %891 = vmatprep.mubr.f32.mxu0 %v282_v22 }
  0x63   : > { %894 = vmatprep.mubr.f32.mxu1 %v292_v23 }
  0x64   : > { %980 = vmatpush3.bf16.msra.mxu0 %v977_v18 }
  0x65   : > { %1005 = vmatpush3.bf16.msra.mxu1 %v977_v18  ;;  %982 = vmatprep.subr.bf16.mxu0 %v981_v24  ;;  %v662_v18 = vld [vmem:[%s1374_s3 + $0x8] sm:$0xff] (!%p744_p10) }
  0x66   : > { %998 = vmatprep.subr.bf16.mxu1 %v981_v24 }
  0x68   : > { %984 = vmatpush3.bf16.msra.mxu0 %v981_v24 }
  0x69   : > { %1006 = vmatpush3.bf16.msra.mxu1 %v981_v24  ;;  %986 = vmatprep.subr.bf16.mxu0 %v985_v27 }
  0x6a   : > { %999 = vmatprep.subr.bf16.mxu1 %v985_v27 }
  0x6c   : > { %988 = vmatpush3.bf16.msra.mxu0 %v985_v27 }
  0x6d   : > { %1007 = vmatpush3.bf16.msra.mxu1 %v985_v27  ;;  %990 = vmatprep.subr.bf16.mxu0 %v989_v30 }
  0x6e   : > { %1000 = vmatprep.subr.bf16.mxu1 %v989_v30 }
  0x70   : > { %992 = vmatpush3.bf16.msra.mxu0 %v989_v30 }
  0x71   : > { %1008 = vmatpush3.bf16.msra.mxu1 %v989_v30 }
  0x73   : > { %892 = vmatmul.mubr.f32.vlgmr.msra.gmra.mrb[8].mxu0 %v287_v31 }
  0x74   : > { %895 = vmatmul.mubr.f32.vlgmr.msra.gmra.mrb[8].mxu1 %v297_v32 }
 0x126   : > { %v783_v33 = vpop.f32.mrb[0].mxu0 }
 0x127   : > { %v827_v34 = vpop.f32.mrb[0].mxu1  ;;  %v784_v35 = vpop.f32.mrb[1].mxu0 }
 0x128   : > { %v785_v36 = vadd.f32 %v784_v35, %v783_v33  ;;  %v828_v37 = vpop.f32.mrb[1].mxu1 }
 0x129   : > { %v829_v38 = vadd.f32 %v828_v37, %v827_v34 }
 0x12a   : > { %v786_v39 = vpop.f32.mrb[2].mxu0 }
 0x12b   : > { %v830_v40 = vpop.f32.mrb[2].mxu1  ;;  %v787_v41 = vpop.f32.mrb[3].mxu0  ;;  %v530_v42 = vadd.f32 %v829_v38, %v785_v36 }
 0x12c   : > { %v788_v43 = vadd.f32 %v787_v41, %v786_v39  ;;  %v831_v44 = vpop.f32.mrb[3].mxu1 }
 0x12d   : > { %v832_v45 = vadd.f32 %v831_v44, %v830_v40 }
 0x12e   : > { %v789_v46 = vpop.f32.mrb[4].mxu0 }
 0x12f   : > { %v833_v47 = vpop.f32.mrb[4].mxu1  ;;  %v790_v48 = vpop.f32.mrb[5].mxu0  ;;  %v535_v49 = vadd.f32 %v832_v45, %v788_v43 }
 0x130   : > { %v791_v50 = vadd.f32 %v790_v48, %v789_v46  ;;  %v834_v51 = vpop.f32.mrb[5].mxu1 }
 0x131   : > { %v835_v52 = vadd.f32 %v834_v51, %v833_v47 }
 0x132   : > { %v792_v53 = vpop.f32.mrb[6].mxu0 }
 0x133   : > { %v836_v54 = vpop.f32.mrb[6].mxu1  ;;  %v793_v55 = vpop.f32.mrb[7].mxu0  ;;  %v540_v56 = vadd.f32 %v835_v52, %v791_v50 }
 0x134   : > { %v794_v57 = vadd.f32 %v793_v55, %v792_v53  ;;  %v837_v58 = vpop.f32.mrb[7].mxu1 }
 0x135   : > { %v838_v59 = vadd.f32 %v837_v58, %v836_v54 }
 0x137   : > { %v545_v60 = vadd.f32 %v838_v59, %v794_v57 }
 0x146   : > { %v893_v62 = vpop.f32.mrb[8].mxu0 }
 0x147   : > { %v620_v63 = vadd.f32 %v893_v62, %v535_v49  ;;  %v896_v1 = vpop.f32.mrb[8].mxu1  ;;  %v614_v3 = vpop.f32.mrb[9].mxu0  ;;  %645 = sbr.rel (%p744_p10) target bundleno = 346 (0x15a), region = 67 }
 0x148   : > { %v630_v4 = vadd.f32 %v896_v1, %v545_v60  ;;  %v615_v5 = vadd.f32 %v614_v3, %v530_v42  ;;  %v624_v7 = vpop.f32.mrb[9].mxu1 }
 0x149   : > { %v634_v8 = vadd.f32 %v620_v63, %v275_v61  ;;  %v625_v9 = vadd.f32 %v624_v7, %v540_v56 }
 0x14a   : > { %v636_v10 = vadd.f32 %v630_v4, %v277_v0  ;;  %v633_v11 = vadd.f32 %v615_v5, %v274_v2 }
 0x14b   : > { %639 = vst.msk [vmem:[#allocation2 + $0x8] sm:$0xff] %vm637_vm1, %v634_v8  ;;  %v635_v12 = vadd.f32 %v625_v9, %v276_v6 }
 0x14c   : > { %641 = vst.msk [vmem:[#allocation2 + $0x18] sm:$0xff] %vm637_vm1, %v636_v10  ;;  %638 = vst.msk [vmem:[#allocation2] sm:$0xff] %vm637_vm1, %v633_v11 }
 0x14d   : > { %640 = vst.msk [vmem:[#allocation2 + $0x10] sm:$0xff] %vm637_vm1, %v635_v12 }
 0x152   : > { %v647_v17 = vld [vmem:[#allocation2 + $0x8] sm:$0xff] }
 0x153   : > { %v646_v13 = vld [vmem:[#allocation2] sm:$0xff]  ;;  %v658_v20 = vadd.f32 %v745_v14, %v647_v17  ;;  %v649_v22 = vld [vmem:[#allocation2 + $0x18] sm:$0xff] }
 0x154   : > { %v657_v16 = vadd.f32 %v745_v14, %v646_v13  ;;  %v648_v19 = vld [vmem:[#allocation2 + $0x10] sm:$0xff]  ;;  %v660_v24 = vadd.f32 %v745_v14, %v649_v22 }
 0x155   : > { %v659_v21 = vadd.f32 %v745_v14, %v648_v19  ;;  %v664_v25 = vadd.f32 %v662_v18, %v658_v20 }
 0x156   : > { %v663_v23 = vadd.f32 %v661_v15, %v657_v16  ;;  %v666_v27 = vadd.f32 %v662_v18, %v660_v24 }
 0x157   : > { %v665_v26 = vadd.f32 %v661_v15, %v659_v21  ;;  %668 = vst.msk [vmem:[#allocation4 + $0x8] sm:$0xff] %vm637_vm1, %v664_v25 }
 0x158   : > { %667 = vst.msk [vmem:[#allocation4] sm:$0xff] %vm637_vm1, %v663_v23  ;;  %670 = vst.msk [vmem:[#allocation4 + $0x18] sm:$0xff] %vm637_vm1, %v666_v27 }
 0x159   : > { %669 = vst.msk [vmem:[#allocation4 + $0x10] sm:$0xff] %vm637_vm1, %v665_v26 }
 0x15a PF: > { %p1015_p11 = scmp.eq.s32.totalorder %s1144_s18, 1  ;;  %s1100_s21 = smov [#allocation4]  }
 0x15b   : > { %s677_s23 = sshll.u32 %s1100_s21, 4  ;;  %s678_s23 = int_to_ptr.vmem [resolvable:$true] %s677_s23 }
 0x15c   : > { %s1045_s24 = scalar_lea.vmem %s678_s23, 512  ;;  %p1052_p1 = scmp.lt.s32.totalorder %s678_s23, %s678_s23 }
 0x15d   : > { %p1046_p12 = scmp.ne.s32.totalorder %s678_s23, %s1045_s24  ;;  %p1053_p2 = scmp.lt.s32.totalorder %s1045_s24, %s1045_s24 }
 0x15f   : > { %p1047_p13 = pnand %p1046_p12, %p1015_p11  ;;  %p1054_p3 = por %p1053_p2, %p1052_p1 }
 0x161   : > { %p1048_p0 = pneg %p1047_p13 }
 0x163   : > { %p1055_p4 = pnand %p1054_p3, %p1048_p0 }
 0x165   : > { %1058 = shalt.err (!%p1055_p4)
}
 0x166   : > { %s1059_s27 = scalar_lea.hbm %s1375_s4, 512 }
 0x167   : > { %p1060_p5 = scmp.ne.s32.totalorder %s1375_s4, %s1059_s27  ;;  %p1065_p8 = scmp.lt.u32.totalorder %s1059_s27, %s1375_s4 }
 0x169   : > { %p1061_p6 = pnand %p1060_p5, %p1015_p11 }
 0x16b   : > { %p1062_p7 = pneg %p1061_p6 }
 0x16d   : > { %p1067_p9 = pnand %p1065_p8, %p1062_p7 }
 0x16f   : > { %1070 = shalt.err (!%p1067_p9)
}
 0x170   : > { %s1101_s6 = smov 128   ;;  %s1102_s7 = smov 8  }
 0x171   : > { %1012 = dma.vmem_to_hbm [thread:$0]  (%p1015_p11), %s678_s23, 512, %s1375_s4, [#allocation5], %s1101_s6, %s1101_s6, %s1102_s7  }
 0x172   : > { %1084 = dma.done.wait (%p1015_p11), [#allocation5], 512  }
 0x173   : > { %1086 = vsyncadd (%p1015_p11), [#allocation5], 4294966784 }
 0x174 PF: > { %p12_p10 = scmp.ge.s32.totalorder %s1147_s19, 4   ;;  %s1376_s15 = smov %s1093_s16 }
 0x175   : > { %s1377_s16 = smov %s1156_s22  ;;  %s1378_s17 = smov %s1147_s19 }
 0x176   :  { %14 = sbr.rel (!%p12_p10) target bundleno = 2 (0x2), region = 102 }
 0x17d   :  { %693 = vsyncpa [#allocation5], 1 }
 0x17e   :  { %695 = vsyncpa [#allocation5 + $0x1], 1 }

</bundles_post_ra>
